<compile_context>
chip_gen: v5e
topology: v5e:2x2
jax: 0.10.0
libtpu: 0.0.40
codegen_flags: <defaults>
</compile_context>

<pallas_src>
import functools
import math

import jax
import jax.numpy as jnp
from jax.experimental import pallas as pl
from jax.experimental.pallas import tpu as pltpu


def lambda_init_fn(depth):
    return 0.8 - 0.6 * math.exp(-0.3 * depth)


# ---------------------------------------------------------------------------
# Row-tiled projection matmul: (M, K) @ (K, N) -> (M, N)
# ---------------------------------------------------------------------------
def _matmul_kernel(x_ref, w_ref, o_ref):
    o_ref[...] = jnp.dot(x_ref[...], w_ref[...],
                         preferred_element_type=jnp.float32).astype(o_ref.dtype)


def _matmul(x, w, *, tile_m=256):
    M, K = x.shape
    K2, N = w.shape
    assert K == K2
    tm = M if M <= tile_m else tile_m
    grid_m = pl.cdiv(M, tm)
    # TODO(synk): for large K (>~2k) add a K reduction grid axis + VMEM f32
    # accumulator so (tm, K) / (K, N) tiles stay within v7x's 64 MiB VMEM.
    return pl.pallas_call(
        _matmul_kernel,
        out_shape=jax.ShapeDtypeStruct((M, N), x.dtype),
        grid_spec=pltpu.PrefetchScalarGridSpec(
            num_scalar_prefetch=0,
            grid=(grid_m,),
            in_specs=[
                pl.BlockSpec((tm, K), lambda i: (i, 0)),   # streamed rows
                pl.BlockSpec((K, N), lambda i: (0, 0)),    # resident weights
            ],
            out_specs=pl.BlockSpec((tm, N), lambda i: (i, 0)),
        ),
        compiler_params=pltpu.CompilerParams(
            dimension_semantics=("parallel",)),
        cost_estimate=pl.CostEstimate(
            flops=2 * M * K * N,
            transcendentals=0,
            bytes_accessed=(M * K + K * N + M * N) * x.dtype.itemsize),
    )(x, w)


# ---------------------------------------------------------------------------
# Fused differential attention kernel (one batch element, one head per step)
# ---------------------------------------------------------------------------
def _nan_to_num_f32(s):
    finfo = jnp.finfo(jnp.float32)
    s = jnp.clip(s, finfo.min, finfo.max)      # +/- inf -> finite extremes
    return jnp.where(jnp.isnan(s), 0.0, s)     # nan -> 0


def _softmax_last(s):
    m = jnp.max(s, axis=-1, keepdims=True)
    e = jnp.exp(s - m)
    return e / jnp.sum(e, axis=-1, keepdims=True)


def _diff_attn_kernel(lam_ref, gamma_ref, q_ref, k_ref, v_ref, o_ref, *,
                      scaling, lambda_init, eps):
    # q_ref, k_ref: (1, 2, S, D)   -- the two differential sub-heads
    # v_ref, o_ref: (1, 1, S, 2D)
    # lam_ref: (1, 1) lambda_full; gamma_ref: (1, 2D) RMSNorm weight
    q1 = q_ref[0, 0].astype(jnp.float32) * scaling
    q2 = q_ref[0, 1].astype(jnp.float32) * scaling
    k1 = k_ref[0, 0].astype(jnp.float32)
    k2 = k_ref[0, 1].astype(jnp.float32)
    v = v_ref[0, 0].astype(jnp.float32)

    s1 = jnp.dot(q1, k1.T, preferred_element_type=jnp.float32)
    s2 = jnp.dot(q2, k2.T, preferred_element_type=jnp.float32)
    p1 = _softmax_last(_nan_to_num_f32(s1))
    p2 = _softmax_last(_nan_to_num_f32(s2))

    p = p1 - lam_ref[...] * p2                              # (1,1) broadcast
    attn = jnp.dot(p, v, preferred_element_type=jnp.float32)  # (S, 2D)

    # RMSNorm(2*head_dim) sub-layer norm + (1 - lambda_init) rescale.
    ms = jnp.mean(attn * attn, axis=-1, keepdims=True)
    attn = attn * jax.lax.rsqrt(ms + eps) * gamma_ref[...]
    attn = attn * (1.0 - lambda_init)

    o_ref[0, 0] = attn.astype(o_ref.dtype)


# ---------------------------------------------------------------------------
# Full forward pass
# ---------------------------------------------------------------------------
def differential_mha(x, w_q, w_k, w_v, w_o,
                     lambda_q1, lambda_k1, lambda_q2, lambda_k2,
                     rms_weight, *, depth, num_heads):
    B, S, E = x.shape
    H = num_heads
    D = E // H // 2
    assert E == H * 2 * D
    scaling = float(D) ** -0.5
    lambda_init = lambda_init_fn(depth)

    # Fused QKV projection: one row-tiled matmul instead of three.
    x2d = x.reshape(B * S, E)
    w_qkv_t = jnp.concatenate([w_q.T, w_k.T, w_v.T], axis=1)   # (E, 3E)
    qkv = _matmul(x2d, w_qkv_t)                                # (B*S, 3E)
    q2d, k2d, v2d = qkv[:, :E], qkv[:, E:2 * E], qkv[:, 2 * E:]

    # Head layout (layout glue only, matches the PyTorch view/transpose).
    q = q2d.reshape(B, S, 2 * H, D).transpose(0, 2, 1, 3)      # (B, 2H, S, D)
    k = k2d.reshape(B, S, 2 * H, D).transpose(0, 2, 1, 3)      # (B, 2H, S, D)
    v = v2d.reshape(B, S, H, 2 * D).transpose(0, 2, 1, 3)      # (B, H, S, 2D)

    # lambda_full is parameter-only O(D) work: compute once in the wrapper.
    lam_full = (jnp.exp(jnp.sum(lambda_q1 * lambda_k1)) -
                jnp.exp(jnp.sum(lambda_q2 * lambda_k2)) + lambda_init)
    lam_full = lam_full.astype(jnp.float32).reshape(1, 1)
    gamma = rms_weight.astype(jnp.float32).reshape(1, 2 * D)

    kernel = functools.partial(_diff_attn_kernel, scaling=scaling,
                               lambda_init=lambda_init, eps=1e-5)
    attn = pl.pallas_call(
        kernel,
        out_shape=jax.ShapeDtypeStruct((B, H, S, 2 * D), x.dtype),
        grid_spec=pltpu.PrefetchScalarGridSpec(
            num_scalar_prefetch=0,
            grid=(B, H),
            in_specs=[
                pl.BlockSpec((1, 1), lambda b, h: (0, 0)),              # lambda
                pl.BlockSpec((1, 2 * D), lambda b, h: (0, 0)),          # gamma
                pl.BlockSpec((1, 2, S, D), lambda b, h: (b, h, 0, 0)),  # q pair
                pl.BlockSpec((1, 2, S, D), lambda b, h: (b, h, 0, 0)),  # k pair
                pl.BlockSpec((1, 1, S, 2 * D), lambda b, h: (b, h, 0, 0)),  # v
            ],
            out_specs=pl.BlockSpec((1, 1, S, 2 * D), lambda b, h: (b, h, 0, 0)),
        ),
        compiler_params=pltpu.CompilerParams(
            dimension_semantics=("parallel", "parallel")),
        cost_estimate=pl.CostEstimate(
            flops=8 * B * H * S * S * D,
            transcendentals=2 * B * H * S * S,
            bytes_accessed=4 * 4 * B * H * S * 2 * D),
    )(lam_full, gamma, q, k, v)

    # Merge heads and output projection.
    attn2d = attn.transpose(0, 2, 1, 3).reshape(B * S, E)
    out2d = _matmul(attn2d, w_o.T)
    return out2d.reshape(B, S, E)


# ---------------------------------------------------------------------------
# Pure-JAX reference (mirrors the PyTorch forward exactly)
# ---------------------------------------------------------------------------
def _reference(x, w_q, w_k, w_v, w_o, lq1, lk1, lq2, lk2, g, *,
               depth, num_heads):
    B, S, E = x.shape
    H = num_heads
    D = E // H // 2
    lambda_init = lambda_init_fn(depth)
    q = (x @ w_q.T).reshape(B, S, 2 * H, D).transpose(0, 2, 1, 3)
    k = (x @ w_k.T).reshape(B, S, 2 * H, D).transpose(0, 2, 1, 3)
    v = (x @ w_v.T).reshape(B, S, H, 2 * D).transpose(0, 2, 1, 3)
    q = q * (float(D) ** -0.5)
    aw = jnp.einsum('bhqd,bhkd->bhqk', q, k)
    aw = jnp.nan_to_num(aw)
    aw = jax.nn.softmax(aw.astype(jnp.float32), axis=-1).astype(aw.dtype)
    lam = (jnp.exp(jnp.sum(lq1 * lk1)) - jnp.exp(jnp.sum(lq2 * lk2))
           + lambda_init)
    aw = aw.reshape(B, H, 2, S, S)
    aw = aw[:, :, 0] - lam * aw[:, :, 1]
    attn = jnp.einsum('bhqk,bhkd->bhqd', aw, v)
    ms = jnp.mean(attn * attn, axis=-1, keepdims=True)
    attn = attn * jax.lax.rsqrt(ms + 1e-5) * g
    attn = attn * (1.0 - lambda_init)
    attn = attn.transpose(0, 2, 1, 3).reshape(B, S, H * 2 * D)
    return attn @ w_o.T


if __name__ == "__main__":
    B, S, E = 2, 8, 32
    num_heads = 2
    depth = 1
    D = E // num_heads // 2   # 8

    key = jax.random.PRNGKey(0)
    ks = jax.random.split(key, 10)
    x = jax.random.normal(ks[0], (B, S, E), dtype=jnp.float32)
    init = (1.0 / E) ** 0.5
    w_q = jax.random.normal(ks[1], (E, E), dtype=jnp.float32) * init
    w_k = jax.random.normal(ks[2], (E, E), dtype=jnp.float32) * init
    w_v = jax.random.normal(ks[3], (E, E), dtype=jnp.float32) * init
    w_o = jax.random.normal(ks[4], (E, E), dtype=jnp.float32) * init
    lq1 = jax.random.normal(ks[5], (D,), dtype=jnp.float32) * 0.1
    lk1 = jax.random.normal(ks[6], (D,), dtype=jnp.float32) * 0.1
    lq2 = jax.random.normal(ks[7], (D,), dtype=jnp.float32) * 0.1
    lk2 = jax.random.normal(ks[8], (D,), dtype=jnp.float32) * 0.1
    g = 1.0 + 0.1 * jax.random.normal(ks[9], (2 * D,), dtype=jnp.float32)

    out = differential_mha(x, w_q, w_k, w_v, w_o, lq1, lk1, lq2, lk2, g,
                           depth=depth, num_heads=num_heads)
    out = jax.block_until_ready(out)

    ref = _reference(x, w_q, w_k, w_v, w_o, lq1, lk1, lq2, lk2, g,
                     depth=depth, num_heads=num_heads)
    assert out.shape == (B, S, E)
    assert jnp.allclose(out, ref, atol=2e-3, rtol=2e-3), float(
        jnp.max(jnp.abs(out - ref)))

    print("KERNEL_OK")
</pallas_src>

<mosaic_0001>
module attributes {stable_mosaic.version = 11 : i64} {
  func.func @_matmul_kernel(%arg0: i32, %arg1: memref<16x32xf32, #tpu.memory_space<vmem>>, %arg2: memref<32x96xf32, #tpu.memory_space<vmem>>, %arg3: memref<16x96xf32, #tpu.memory_space<vmem>>) attributes {dimension_semantics = [#tpu.dimension_semantics<parallel>], iteration_bounds = array<i64: 1>, scalar_prefetch = 0 : i64, scratch_operands = 0 : i64, tpu.core_type = #tpu.core_type<tc>, window_params = [{transform_indices = @transform_0, window_bounds = array<i64: 16, 32>}, {pipeline_mode = #tpu.pipeline_mode<synchronous>, transform_indices = @transform_1, window_bounds = array<i64: 32, 96>}, {transform_indices = @transform_2, window_bounds = array<i64: 16, 96>}]} {
    %c0 = arith.constant 0 : index
    %c0_0 = arith.constant 0 : index
    %0 = vector.load %arg1[%c0, %c0_0] : memref<16x32xf32, #tpu.memory_space<vmem>>, vector<16x32xf32>
    %c0_1 = arith.constant 0 : index
    %c0_2 = arith.constant 0 : index
    %1 = vector.load %arg2[%c0_1, %c0_2] : memref<32x96xf32, #tpu.memory_space<vmem>>, vector<32x96xf32>
    %cst = arith.constant dense<0.000000e+00> : vector<16x96xf32>
    %2 = tpu.matmul %0, %1, %cst {dimension_numbers = #tpu.dot_dimension_numbers<[1], [0], [0], [1], [0, 0, 1, 1], [], []>} : vector<16x32xf32>, vector<32x96xf32>, vector<16x96xf32> -> vector<16x96xf32>
    %c0_3 = arith.constant 0 : index
    %c0_4 = arith.constant 0 : index
    %3 = vector.load %arg3[%c0_3, %c0_4] : memref<16x96xf32, #tpu.memory_space<vmem>>, vector<16x96xf32>
    tpu.vector_store %arg3[%c0_3, %c0_4], %2 {strides = array<i32>} : memref<16x96xf32, #tpu.memory_space<vmem>>, vector<16x96xf32>,
    return
  }
  func.func @transform_0(%arg0: i32) -> (i32, i32) {
    %c0_i32 = arith.constant 0 : i32
    %c0_i32_0 = arith.constant 0 : i32
    return %arg0, %c0_i32 : i32, i32
  }
  func.func @transform_1(%arg0: i32) -> (i32, i32) {
    %c0_i32 = arith.constant 0 : i32
    %c0_i32_0 = arith.constant 0 : i32
    %c0_i32_1 = arith.constant 0 : i32
    return %c0_i32, %c0_i32_0 : i32, i32
  }
  func.func @transform_2(%arg0: i32) -> (i32, i32) {
    %c0_i32 = arith.constant 0 : i32
    %c0_i32_0 = arith.constant 0 : i32
    return %arg0, %c0_i32 : i32, i32
  }
}

</mosaic_0001>

<bundles_post_ra>
// kernel: tpu_custom_call.1
= control target key start
LH: loop header
LB: loop body
LE: loop exit
PB: predicated region body
PF: predicated region fallthrough
CT: control target
= control target key end

     0   :  { %7 = vsyncpa [#allocation3], 0  ;;  %s230_s0 = inlined_call_operand.hbm [shape: f32[16,32], index: 0, kind: input, shape index: {}]   ;;  %s231_s1 = inlined_call_operand.hbm [shape: f32[32,96], index: 1, kind: input, shape index: {}]   ;;  %s232_s2 = inlined_call_operand.hbm [shape: f32[16,96], index: 2, kind: output, shape index: {}]  }
   0x1   :  { %8 = vsyncpa [#allocation6], 0 }
   0x2   :  { %9 = vsyncpa [#allocation4], 0  ;;  %s14_s11 = sshll.u32 %s230_s0, 4  ;;  %s192_s12 = smov [#allocation2]   ;;  %s15_s11 = int_to_ptr.hbm [resolvable:$true] %s14_s11 }
   0x3   :  { %s16_s13 = sshll.u32 %s192_s12, 4  ;;  %s27_s16 = sshll.u32 %s231_s1, 4  ;;  %s17_s13 = int_to_ptr.vmem [resolvable:$true] %s16_s13  ;;  %s28_s16 = int_to_ptr.hbm [resolvable:$true] %s27_s16 }
   0x4   :  { %s193_s17 = smov 128   ;;  %s194_s18 = smov 8  }
   0x5   :  { %22 = dma.hbm_to_vmem [thread:$0]  %s15_s11, 256, %s17_s13, [#allocation3], %s193_s17, %s193_s17, %s194_s18  }
   0x6   :  { %s195_s19 = smov [#allocation5]  }
   0x7   :  { %s29_s20 = sshll.u32 %s195_s19, 4  ;;  %s30_s20 = int_to_ptr.vmem [resolvable:$true] %s29_s20 }
   0x8   :  { %35 = dma.hbm_to_vmem [thread:$0]  %s28_s16, 512, %s30_s20, [#allocation6], %s193_s17, %s193_s17, %s194_s18  }
   0x9   :  { %186 = dma.done.wait [#allocation3], 256  }
   0xa   :  { %187 = vsyncadd [#allocation3], 4294967040 }
   0xb   :  { %188 = dma.done.wait [#allocation6], 512  }
   0xc   :  { %189 = vsyncadd [#allocation6], 4294966784  ;;  %v49_v0 = vld [vmem:[#allocation5 + $0x18] sm:$0xff]  ;;  %v48_v1 = vld [vmem:[#allocation5 + $0x10] sm:$0xff]  ;;  %vm50_vm0 = vcmask 261120   ;;  %s196_s0 = smov [#allocation7]  }
   0xd   :  { %69 = vmatpush.msra.mxu0 %v49_v0  ;;  %105 = vmatpush.msra.mxu1 %v49_v0  ;;  %v47_v2 = vld [vmem:[#allocation5 + $0x8] sm:$0xff]  ;;  %v46_v3 = vld [vmem:[#allocation5] sm:$0xff]  ;;  %v44_v4 = vld [vmem:[#allocation2] sm:$0xff]  ;;  %s87_s1 = sshll.u32 %s196_s0, 4  ;;  %s89_s23 = sshll.u32 %s232_s2, 4  ;;  %vm80_vm1 = vcmask 785408   ;;  %s88_s1 = int_to_ptr.vmem [resolvable:$true] %s87_s1  ;;  %s90_s23 = int_to_ptr.hbm [resolvable:$true] %s89_s23 }
   0xe   :  { %v45_v5 = vld [vmem:[#allocation2 + $0x8] sm:$0xff] }
   0xf   :  { %70 = vmatpush.msra.mxu0 %v48_v1  ;;  %106 = vmatpush.msra.mxu1 %v48_v1 }
  0x11   :  { %71 = vmatpush.msra.mxu0 %v47_v2  ;;  %107 = vmatpush.msra.mxu1 %v47_v2 }
  0x13   :  { %72 = vmatpush.msra.mxu0 %v46_v3  ;;  %108 = vmatpush.msra.mxu1 %v46_v3 }
  0x14   :  { %103 = vmatmul.msk.f32.vlgmr.msra.gmra.mxu0 %vm50_vm0, %v44_v4  ;;  %104 = vmatmul.msk.f32.vlgmr.msra.gmra.mxu1 %vm50_vm0, %v45_v5 }
  0x91   :  { %v74_v6 = vpop.f32.mrf.mxu0  ;;  %v77_v7 = vpop.f32.mrf.mxu1 }
  0x92   :  { %81 = vst.msk [vmem:[#allocation7] sm:$0xff] %vm80_vm1, %v74_v6 }
  0x93   :  { %82 = vst.msk [vmem:[#allocation7 + $0x8] sm:$0xff] %vm80_vm1, %v77_v7 }
  0x94   :  { %95 = dma.vmem_to_hbm [thread:$0]  %s88_s1, 256, %s90_s23, [#allocation4], %s193_s17, %s193_s17, %s194_s18  }
  0x95   :  { %190 = dma.done.wait [#allocation4], 256  }
  0x96   :  { %191 = vsyncadd [#allocation4], 4294967040 }
  0x97   :  { %100 = vsyncpa [#allocation3], 1 }
  0x98   :  { %101 = vsyncpa [#allocation6], 1 }
  0x99   :  { %102 = vsyncpa [#allocation4], 1 }

</bundles_post_ra>
